<compile_context>
chip_gen: v7x
topology: tpu7x:2x2x1
jax: 0.10.0
libtpu: 0.0.40
codegen_flags: <defaults>
</compile_context>

<pallas_src>
import math

import jax
import jax.numpy as jnp
from jax.experimental import pallas as pl
from jax.experimental.pallas import tpu as pltpu

LANE = 128          # TPU vreg lane width; every logical feature slab pads to this
SUBLANE = 8
N_CELLS = 3         # inter -> command -> motor
N_HEADS = 4         # [g | h | gate(=f_g+f_h folded) | proj]
MAX_TILE_B = 512    # batch rows per grid step (tile is still tiny vs VMEM)


def _round_up(x: int, m: int) -> int:
    return ((x + m - 1) // m) * m


def _fused_ncp_kernel(obs_ref, h_ref, w_ref, b_ref, act_ref, newh_ref, xh_ref):
    """All three liquid cells for one batch tile, entirely in VMEM.

    obs_ref : (TB, LANE)                  f32 padded observations
    h_ref   : (TB, N_CELLS*LANE)          f32 hidden segments, one 128-lane slot per cell
    w_ref   : (N_CELLS, 2*LANE, 4*LANE)   bf16 stacked [Wx ; Wh] weights, 4 heads side by side
    b_ref   : (N_CELLS, 1, 4*LANE)        f32 biases
    act_ref : (TB, LANE)                  f32 tanh-squashed actions slab
    newh_ref: (TB, N_CELLS*LANE)          f32 new hidden slab (aliased with h input)
    xh_ref  : (TB, 2*LANE)                bf16 scratch for the fused K=256 contraction
    """
    x = obs_ref[...]                                         # (TB, LANE) f32
    for i in range(N_CELLS):                                 # static unroll (3 cells)
        lo = i * LANE
        # Two contiguous, lane-tile-aligned stores build the [x | h] K=256 slab.
        xh_ref[:, :LANE] = x.astype(jnp.bfloat16)
        xh_ref[:, LANE:] = h_ref[:, lo:lo + LANE].astype(jnp.bfloat16)
        # One bf16 MXU contraction over K=256, N=512 (f32 accumulate).
        z = (jnp.dot(xh_ref[...], w_ref[i], preferred_element_type=jnp.float32)
             + b_ref[i])                                     # (TB, 4*LANE) f32
        # sigmoid via tanh identity: single EUP op, exact (no approx reciprocal).
        gate = 0.5 * (1.0 + jnp.tanh(0.5 * z[:, 2 * LANE:3 * LANE]))
        new_h = (jnp.tanh(z[:, :LANE]) * (1.0 - gate)
                 + jnp.tanh(z[:, LANE:2 * LANE]) * gate)
        newh_ref[:, lo:lo + LANE] = new_h                    # full-width unmasked store
        x = z[:, 3 * LANE:] + new_h                          # feeds next cell (VMEM only)
    act_ref[...] = jnp.tanh(x)                               # DDPGActor's torch.tanh(actions)


def _fused_forward(obs_pad, h_pad, w, b, tile_b):
    rows = obs_pad.shape[0]
    grid = (rows // tile_b,)
    out_shape = (
        jax.ShapeDtypeStruct((rows, LANE), jnp.float32),             # actions slab
        jax.ShapeDtypeStruct((rows, N_CELLS * LANE), jnp.float32),   # new hidden slab
    )
    return pl.pallas_call(
        _fused_ncp_kernel,
        out_shape=out_shape,
        grid=grid,
        in_specs=[
            pl.BlockSpec((tile_b, LANE), lambda i: (i, 0)),                         # obs
            pl.BlockSpec((tile_b, N_CELLS * LANE), lambda i: (i, 0)),               # hidden
            pl.BlockSpec((N_CELLS, 2 * LANE, N_HEADS * LANE), lambda i: (0, 0, 0)),  # W (bf16)
            pl.BlockSpec((N_CELLS, 1, N_HEADS * LANE), lambda i: (0, 0, 0)),         # bias
        ],
        out_specs=(
            pl.BlockSpec((tile_b, LANE), lambda i: (i, 0)),
            pl.BlockSpec((tile_b, N_CELLS * LANE), lambda i: (i, 0)),
        ),
        scratch_shapes=[pltpu.VMEM((tile_b, 2 * LANE), jnp.bfloat16)],
        # Reuse the hidden-state input buffer for the new-hidden output (in-place update).
        input_output_aliases={1: 1},
        compiler_params=pltpu.CompilerParams(
            dimension_semantics=("parallel",)),
    )(obs_pad, h_pad, w, b)


def _choose_tiling(batch: int):
    rows = _round_up(max(batch, SUBLANE), SUBLANE)
    if rows <= SUBLANE:
        return rows, rows
    # >= 2 grid steps so v7x's two TensorCores both get work; cap tile to amortize
    # per-step overhead while staying tiny vs VMEM on every generation.
    tile_b = min(MAX_TILE_B, _round_up((rows + 1) // 2, SUBLANE))
    rows = _round_up(rows, tile_b)
    return rows, tile_b


def init_ddpg_actor_params(key, num_obs: int, n_neurons: int, num_actions: int,
                           sparsity_level: float = 0.5):
    """Deterministic synthetic parameters matching velora's shapes, pre-packed
    into the fused lane-dense kernel layout (bf16 weights, folded gate heads).
    Also keeps the logical (unpadded) 4-head weights under 'ref' for a plain-JAX
    parity check.

    NCP split (velora Wiring): command = max(int(0.4*n_neurons), 1),
    inter = n_neurons - command, motor = num_actions. Each cell has 5
    Linear(head_size -> n_hid) heads sharing one sparsity mask; the two gate
    heads are folded into one here (exact algebraic identity).
    """
    n_command = max(int(0.4 * n_neurons), 1)
    n_inter = n_neurons - n_command
    layer_dims = [(num_obs, n_inter), (n_inter, n_command), (n_command, num_actions)]
    assert len(layer_dims) == N_CELLS

    w = jnp.zeros((N_CELLS, 2 * LANE, N_HEADS * LANE), jnp.float32)
    bb = jnp.zeros((N_CELLS, 1, N_HEADS * LANE), jnp.float32)
    ref = []
    for i, (in_f, n_hid) in enumerate(layer_dims):
        assert 0 < in_f <= LANE and 0 < n_hid <= LANE
        head = in_f + n_hid
        key, kw, kb, km = jax.random.split(key, 4)
        bound = 1.0 / math.sqrt(head)  # PyTorch nn.Linear default init bound
        w5 = jax.random.uniform(kw, (head, 5, n_hid), jnp.float32, -bound, bound)
        b5 = jax.random.uniform(kb, (5, n_hid), jnp.float32, -bound, bound)
        # TODO(synk): velora builds its NCP wiring masks from a random sparse
        # polarity graph; a deterministic synthetic binary mask of the same shape
        # is used here and folded into the weights (parameter setup, not compute).
        mask = (jax.random.uniform(km, (head, n_hid)) > sparsity_level).astype(jnp.float32)
        w5 = w5 * mask[:, None, :]
        # Fold f_g + f_h into a single gate head -> kernel heads [g, h, gate, proj].
        w4 = jnp.stack([w5[:, 0], w5[:, 1], w5[:, 2] + w5[:, 3], w5[:, 4]], axis=1)
        b4 = jnp.stack([b5[0], b5[1], b5[2] + b5[3], b5[4]], axis=0)
        # Quantize weights to bf16 once so kernel and reference see identical values.
        w4 = w4.astype(jnp.bfloat16).astype(jnp.float32)
        for k in range(N_HEADS):
            w = w.at[i, :in_f, k * LANE:k * LANE + n_hid].set(w4[:in_f, k, :])           # x rows
            w = w.at[i, LANE:LANE + n_hid, k * LANE:k * LANE + n_hid].set(w4[in_f:, k, :])  # h rows
            bb = bb.at[i, 0, k * LANE:k * LANE + n_hid].set(b4[k])
        ref.append((w4, b4, in_f, n_hid))
    return {"w": w.astype(jnp.bfloat16), "b": bb, "layer_dims": layer_dims, "ref": ref}


def pack_hidden(params, hidden, rows: int):
    """Logical (batch, sum(hid_sizes)) hidden -> packed (rows, 3*LANE) kernel layout."""
    hid_sizes = [d[1] for d in params["layer_dims"]]
    batch = hidden.shape[0]
    h_pad = jnp.zeros((rows, N_CELLS * LANE), jnp.float32)
    off = 0
    for i, n in enumerate(hid_sizes):
        h_pad = h_pad.at[:batch, i * LANE:i * LANE + n].set(
            hidden[:, off:off + n].astype(jnp.float32))
        off += n
    return h_pad


def unpack_hidden(params, hidden_packed, batch: int):
    """Packed (rows, 3*LANE) kernel layout -> logical (batch, sum(hid_sizes))."""
    hid_sizes = [d[1] for d in params["layer_dims"]]
    return jnp.concatenate(
        [hidden_packed[:batch, i * LANE:i * LANE + n] for i, n in enumerate(hid_sizes)],
        axis=1)


def ddpg_actor_forward(params, obs, hidden_packed=None):
    """Equivalent of DDPGActor.forward(obs, hidden) -> (tanh(actions), new_hidden).

    The hidden state is carried between calls in the packed (rows, 3*LANE) kernel
    layout (use pack_hidden / unpack_hidden at API boundaries).
    """
    layer_dims = params["layer_dims"]
    num_obs = layer_dims[0][0]
    num_actions = layer_dims[-1][1]
    batch = obs.shape[0]

    rows, tile_b = _choose_tiling(batch)

    obs_pad = jnp.zeros((rows, LANE), jnp.float32).at[:batch, :num_obs].set(
        obs.astype(jnp.float32))
    if hidden_packed is None:
        h_pad = jnp.zeros((rows, N_CELLS * LANE), jnp.float32)
    else:
        assert hidden_packed.shape == (rows, N_CELLS * LANE), hidden_packed.shape
        h_pad = hidden_packed.astype(jnp.float32)

    act_pad, newh_packed = _fused_forward(obs_pad, h_pad, params["w"], params["b"], tile_b)

    actions = act_pad[:batch, :num_actions]
    return actions, newh_packed


def reference_forward(ref_params, obs, hidden):
    """Plain-JAX reference of the same math (unpadded layout) for parity checks."""
    x = obs
    new_hs = []
    start = 0
    for (w4, b4, in_f, n_hid) in ref_params:
        h = hidden[:, start:start + n_hid]
        xh = jnp.concatenate([x, h], axis=1).astype(jnp.bfloat16)
        z = jnp.dot(xh, w4.reshape(in_f + n_hid, N_HEADS * n_hid).astype(jnp.bfloat16),
                    preferred_element_type=jnp.float32) + b4.reshape(1, N_HEADS * n_hid)
        g, hh, gt, pj = [z[:, k * n_hid:(k + 1) * n_hid] for k in range(N_HEADS)]
        gate = 0.5 * (1.0 + jnp.tanh(0.5 * gt))
        new_h = jnp.tanh(g) * (1.0 - gate) + jnp.tanh(hh) * gate
        x = pj + new_h
        new_hs.append(new_h)
        start += n_hid
    return jnp.tanh(x), jnp.concatenate(new_hs, axis=1)


if __name__ == "__main__":
    num_obs, n_neurons, num_actions, batch = 6, 10, 3, 2

    key = jax.random.PRNGKey(0)
    pkey, okey = jax.random.split(key)
    params = init_ddpg_actor_params(pkey, num_obs, n_neurons, num_actions)
    obs = jax.random.normal(okey, (batch, num_obs), dtype=jnp.float32)

    # Step 1: no hidden state.
    actions, h_packed = ddpg_actor_forward(params, obs, hidden_packed=None)
    new_hidden = unpack_hidden(params, h_packed, batch)
    # Step 2: feed the packed hidden state straight back in (no unpack/repack round trip).
    actions2, h_packed2 = ddpg_actor_forward(params, obs, hidden_packed=h_packed)
    new_hidden2 = unpack_hidden(params, h_packed2, batch)

    (actions, new_hidden, actions2, new_hidden2) = jax.block_until_ready(
        (actions, new_hidden, actions2, new_hidden2))

    assert actions.shape == (batch, num_actions), actions.shape
    assert new_hidden.shape == (batch, n_neurons + num_actions), new_hidden.shape
    assert bool(jnp.all(jnp.isfinite(actions)))
    assert bool(jnp.all(jnp.abs(actions) <= 1.0))   # tanh-squashed actions
    assert bool(jnp.all(jnp.isfinite(actions2)))
    assert bool(jnp.all(jnp.abs(actions2) <= 1.0))

    # Parity with the plain-JAX reference (tight tolerance: no approx reciprocal anymore).
    hidden0 = jnp.zeros((batch, n_neurons + num_actions), jnp.float32)
    ref_a1, ref_h1 = reference_forward(params["ref"], obs, hidden0)
    ref_a2, ref_h2 = reference_forward(params["ref"], obs, ref_h1)
    assert bool(jnp.allclose(actions, ref_a1, atol=1e-3, rtol=1e-3))
    assert bool(jnp.allclose(new_hidden, ref_h1, atol=1e-3, rtol=1e-3))
    assert bool(jnp.allclose(actions2, ref_a2, atol=1e-3, rtol=1e-3))
    assert bool(jnp.allclose(new_hidden2, ref_h2, atol=1e-3, rtol=1e-3))

    print("KERNEL_OK")
</pallas_src>

<mosaic_0001>
module attributes {stable_mosaic.version = 11 : i64} {
  func.func @_fused_ncp_kernel(%arg0: i32, %arg1: memref<8x128xf32, #tpu.memory_space<vmem>>, %arg2: memref<8x384xf32, #tpu.memory_space<vmem>>, %arg3: memref<3x256x512xbf16, #tpu.memory_space<vmem>>, %arg4: memref<3x1x512xf32, #tpu.memory_space<vmem>>, %arg5: memref<8x128xf32, #tpu.memory_space<vmem>>, %arg6: memref<8x384xf32, #tpu.memory_space<vmem>>, %arg7: memref<8x256xbf16, #tpu.memory_space<vmem>>) attributes {dimension_semantics = [#tpu.dimension_semantics<parallel>], iteration_bounds = array<i64: 1>, scalar_prefetch = 0 : i64, scratch_operands = 1 : i64, tpu.core_type = #tpu.core_type<tc>, window_params = [{transform_indices = @transform_0, window_bounds = array<i64: 8, 128>}, {transform_indices = @transform_1, window_bounds = array<i64: 8, 384>}, {pipeline_mode = #tpu.pipeline_mode<synchronous>, transform_indices = @transform_2, window_bounds = array<i64: 3, 256, 512>}, {pipeline_mode = #tpu.pipeline_mode<synchronous>, transform_indices = @transform_3, window_bounds = array<i64: 3, 1, 512>}, {transform_indices = @transform_4, window_bounds = array<i64: 8, 128>}, {transform_indices = @transform_5, window_bounds = array<i64: 8, 384>}]} {
    %c0 = arith.constant 0 : index
    %c0_0 = arith.constant 0 : index
    %0 = vector.load %arg1[%c0, %c0_0] : memref<8x128xf32, #tpu.memory_space<vmem>>, vector<8x128xf32>
    %1 = arith.truncf %0 : vector<8x128xf32> to vector<8x128xbf16>
    %c0_1 = arith.constant 0 : index
    %c0_2 = arith.constant 0 : index
    %2 = vector.load %arg7[%c0_1, %c0_2] : memref<8x256xbf16, #tpu.memory_space<vmem>>, vector<8x128xbf16>
    tpu.vector_store %arg7[%c0_1, %c0_2], %1 {strides = array<i32>} : memref<8x256xbf16, #tpu.memory_space<vmem>>, vector<8x128xbf16>,
    %c0_3 = arith.constant 0 : index
    %c0_4 = arith.constant 0 : index
    %3 = vector.load %arg2[%c0_3, %c0_4] : memref<8x384xf32, #tpu.memory_space<vmem>>, vector<8x128xf32>
    %4 = arith.truncf %3 : vector<8x128xf32> to vector<8x128xbf16>
    %c0_5 = arith.constant 0 : index
    %c128 = arith.constant 128 : index
    %5 = vector.load %arg7[%c0_5, %c128] : memref<8x256xbf16, #tpu.memory_space<vmem>>, vector<8x128xbf16>
    tpu.vector_store %arg7[%c0_5, %c128], %4 {strides = array<i32>} : memref<8x256xbf16, #tpu.memory_space<vmem>>, vector<8x128xbf16>,
    %c0_6 = arith.constant 0 : index
    %c0_7 = arith.constant 0 : index
    %6 = vector.load %arg7[%c0_6, %c0_7] : memref<8x256xbf16, #tpu.memory_space<vmem>>, vector<8x256xbf16>
    %c0_8 = arith.constant 0 : index
    %c0_9 = arith.constant 0 : index
    %c0_10 = arith.constant 0 : index
    %7 = vector.load %arg3[%c0_8, %c0_9, %c0_10] : memref<3x256x512xbf16, #tpu.memory_space<vmem>>, vector<1x256x512xbf16>
    %8 = vector.shape_cast %7 : vector<1x256x512xbf16> to vector<256x512xbf16>
    %cst = arith.constant dense<0.000000e+00> : vector<8x512xf32>
    %9 = tpu.matmul %6, %8, %cst {dimension_numbers = #tpu.dot_dimension_numbers<[1], [0], [0], [1], [0, 0, 1, 1], [], []>} : vector<8x256xbf16>, vector<256x512xbf16>, vector<8x512xf32> -> vector<8x512xf32>
    %c0_11 = arith.constant 0 : index
    %c0_12 = arith.constant 0 : index
    %c0_13 = arith.constant 0 : index
    %10 = vector.load %arg4[%c0_11, %c0_12, %c0_13] : memref<3x1x512xf32, #tpu.memory_space<vmem>>, vector<1x1x512xf32>
    %11 = vector.shape_cast %10 : vector<1x1x512xf32> to vector<1x512xf32>
    %12 = vector.broadcast %11 : vector<1x512xf32> to vector<8x512xf32>
    %13 = arith.addf %9, %12 : vector<8x512xf32>
    %14 = vector.extract_strided_slice %13 {offsets = [0, 256], sizes = [8, 128], strides = [1, 1]} : vector<8x512xf32> to vector<8x128xf32>
    %cst_14 = arith.constant 5.000000e-01 : f32
    %15 = vector.broadcast %cst_14 : f32 to vector<8x128xf32>
    %16 = arith.mulf %15, %14 : vector<8x128xf32>
    %17 = math.tanh %16 : vector<8x128xf32>
    %cst_15 = arith.constant 1.000000e+00 : f32
    %18 = vector.broadcast %cst_15 : f32 to vector<8x128xf32>
    %19 = arith.addf %18, %17 : vector<8x128xf32>
    %cst_16 = arith.constant 5.000000e-01 : f32
    %20 = vector.broadcast %cst_16 : f32 to vector<8x128xf32>
    %21 = arith.mulf %20, %19 : vector<8x128xf32>
    %22 = vector.extract_strided_slice %13 {offsets = [0, 0], sizes = [8, 128], strides = [1, 1]} : vector<8x512xf32> to vector<8x128xf32>
    %23 = math.tanh %22 : vector<8x128xf32>
    %cst_17 = arith.constant 1.000000e+00 : f32
    %24 = vector.broadcast %cst_17 : f32 to vector<8x128xf32>
    %25 = arith.subf %24, %21 : vector<8x128xf32>
    %26 = arith.mulf %23, %25 : vector<8x128xf32>
    %27 = vector.extract_strided_slice %13 {offsets = [0, 128], sizes = [8, 128], strides = [1, 1]} : vector<8x512xf32> to vector<8x128xf32>
    %28 = math.tanh %27 : vector<8x128xf32>
    %29 = arith.mulf %28, %21 : vector<8x128xf32>
    %30 = arith.addf %26, %29 : vector<8x128xf32>
    %c0_18 = arith.constant 0 : index
    %c0_19 = arith.constant 0 : index
    %31 = vector.load %arg6[%c0_18, %c0_19] : memref<8x384xf32, #tpu.memory_space<vmem>>, vector<8x128xf32>
    tpu.vector_store %arg6[%c0_18, %c0_19], %30 {strides = array<i32>} : memref<8x384xf32, #tpu.memory_space<vmem>>, vector<8x128xf32>,
    %32 = vector.extract_strided_slice %13 {offsets = [0, 384], sizes = [8, 128], strides = [1, 1]} : vector<8x512xf32> to vector<8x128xf32>
    %33 = arith.addf %32, %30 : vector<8x128xf32>
    %34 = arith.truncf %33 : vector<8x128xf32> to vector<8x128xbf16>
    %c0_20 = arith.constant 0 : index
    %c0_21 = arith.constant 0 : index
    %35 = vector.load %arg7[%c0_20, %c0_21] : memref<8x256xbf16, #tpu.memory_space<vmem>>, vector<8x128xbf16>
    tpu.vector_store %arg7[%c0_20, %c0_21], %34 {strides = array<i32>} : memref<8x256xbf16, #tpu.memory_space<vmem>>, vector<8x128xbf16>,
    %c0_22 = arith.constant 0 : index
    %c128_23 = arith.constant 128 : index
    %36 = vector.load %arg2[%c0_22, %c128_23] : memref<8x384xf32, #tpu.memory_space<vmem>>, vector<8x128xf32>
    %37 = arith.truncf %36 : vector<8x128xf32> to vector<8x128xbf16>
    %c0_24 = arith.constant 0 : index
    %c128_25 = arith.constant 128 : index
    %38 = vector.load %arg7[%c0_24, %c128_25] : memref<8x256xbf16, #tpu.memory_space<vmem>>, vector<8x128xbf16>
    tpu.vector_store %arg7[%c0_24, %c128_25], %37 {strides = array<i32>} : memref<8x256xbf16, #tpu.memory_space<vmem>>, vector<8x128xbf16>,
    %c0_26 = arith.constant 0 : index
    %c0_27 = arith.constant 0 : index
    %39 = vector.load %arg7[%c0_26, %c0_27] : memref<8x256xbf16, #tpu.memory_space<vmem>>, vector<8x256xbf16>
    %c1 = arith.constant 1 : index
    %c0_28 = arith.constant 0 : index
    %c0_29 = arith.constant 0 : index
    %40 = vector.load %arg3[%c1, %c0_28, %c0_29] : memref<3x256x512xbf16, #tpu.memory_space<vmem>>, vector<1x256x512xbf16>
    %41 = vector.shape_cast %40 : vector<1x256x512xbf16> to vector<256x512xbf16>
    %cst_30 = arith.constant dense<0.000000e+00> : vector<8x512xf32>
    %42 = tpu.matmul %39, %41, %cst_30 {dimension_numbers = #tpu.dot_dimension_numbers<[1], [0], [0], [1], [0, 0, 1, 1], [], []>} : vector<8x256xbf16>, vector<256x512xbf16>, vector<8x512xf32> -> vector<8x512xf32>
    %c1_31 = arith.constant 1 : index
    %c0_32 = arith.constant 0 : index
    %c0_33 = arith.constant 0 : index
    %43 = vector.load %arg4[%c1_31, %c0_32, %c0_33] : memref<3x1x512xf32, #tpu.memory_space<vmem>>, vector<1x1x512xf32>
    %44 = vector.shape_cast %43 : vector<1x1x512xf32> to vector<1x512xf32>
    %45 = vector.broadcast %44 : vector<1x512xf32> to vector<8x512xf32>
    %46 = arith.addf %42, %45 : vector<8x512xf32>
    %47 = vector.extract_strided_slice %46 {offsets = [0, 256], sizes = [8, 128], strides = [1, 1]} : vector<8x512xf32> to vector<8x128xf32>
    %cst_34 = arith.constant 5.000000e-01 : f32
    %48 = vector.broadcast %cst_34 : f32 to vector<8x128xf32>
    %49 = arith.mulf %48, %47 : vector<8x128xf32>
    %50 = math.tanh %49 : vector<8x128xf32>
    %cst_35 = arith.constant 1.000000e+00 : f32
    %51 = vector.broadcast %cst_35 : f32 to vector<8x128xf32>
    %52 = arith.addf %51, %50 : vector<8x128xf32>
    %cst_36 = arith.constant 5.000000e-01 : f32
    %53 = vector.broadcast %cst_36 : f32 to vector<8x128xf32>
    %54 = arith.mulf %53, %52 : vector<8x128xf32>
    %55 = vector.extract_strided_slice %46 {offsets = [0, 0], sizes = [8, 128], strides = [1, 1]} : vector<8x512xf32> to vector<8x128xf32>
    %56 = math.tanh %55 : vector<8x128xf32>
    %cst_37 = arith.constant 1.000000e+00 : f32
    %57 = vector.broadcast %cst_37 : f32 to vector<8x128xf32>
    %58 = arith.subf %57, %54 : vector<8x128xf32>
    %59 = arith.mulf %56, %58 : vector<8x128xf32>
    %60 = vector.extract_strided_slice %46 {offsets = [0, 128], sizes = [8, 128], strides = [1, 1]} : vector<8x512xf32> to vector<8x128xf32>
    %61 = math.tanh %60 : vector<8x128xf32>
    %62 = arith.mulf %61, %54 : vector<8x128xf32>
    %63 = arith.addf %59, %62 : vector<8x128xf32>
    %c0_38 = arith.constant 0 : index
    %c128_39 = arith.constant 128 : index
    %64 = vector.load %arg6[%c0_38, %c128_39] : memref<8x384xf32, #tpu.memory_space<vmem>>, vector<8x128xf32>
    tpu.vector_store %arg6[%c0_38, %c128_39], %63 {strides = array<i32>} : memref<8x384xf32, #tpu.memory_space<vmem>>, vector<8x128xf32>,
    %65 = vector.extract_strided_slice %46 {offsets = [0, 384], sizes = [8, 128], strides = [1, 1]} : vector<8x512xf32> to vector<8x128xf32>
    %66 = arith.addf %65, %63 : vector<8x128xf32>
    %67 = arith.truncf %66 : vector<8x128xf32> to vector<8x128xbf16>
    %c0_40 = arith.constant 0 : index
    %c0_41 = arith.constant 0 : index
    %68 = vector.load %arg7[%c0_40, %c0_41] : memref<8x256xbf16, #tpu.memory_space<vmem>>, vector<8x128xbf16>
    tpu.vector_store %arg7[%c0_40, %c0_41], %67 {strides = array<i32>} : memref<8x256xbf16, #tpu.memory_space<vmem>>, vector<8x128xbf16>,
    %c0_42 = arith.constant 0 : index
    %c256 = arith.constant 256 : index
    %69 = vector.load %arg2[%c0_42, %c256] : memref<8x384xf32, #tpu.memory_space<vmem>>, vector<8x128xf32>
    %70 = arith.truncf %69 : vector<8x128xf32> to vector<8x128xbf16>
    %c0_43 = arith.constant 0 : index
    %c128_44 = arith.constant 128 : index
    %71 = vector.load %arg7[%c0_43, %c128_44] : memref<8x256xbf16, #tpu.memory_space<vmem>>, vector<8x128xbf16>
    tpu.vector_store %arg7[%c0_43, %c128_44], %70 {strides = array<i32>} : memref<8x256xbf16, #tpu.memory_space<vmem>>, vector<8x128xbf16>,
    %c0_45 = arith.constant 0 : index
    %c0_46 = arith.constant 0 : index
    %72 = vector.load %arg7[%c0_45, %c0_46] : memref<8x256xbf16, #tpu.memory_space<vmem>>, vector<8x256xbf16>
    %c2 = arith.constant 2 : index
    %c0_47 = arith.constant 0 : index
    %c0_48 = arith.constant 0 : index
    %73 = vector.load %arg3[%c2, %c0_47, %c0_48] : memref<3x256x512xbf16, #tpu.memory_space<vmem>>, vector<1x256x512xbf16>
    %74 = vector.shape_cast %73 : vector<1x256x512xbf16> to vector<256x512xbf16>
    %cst_49 = arith.constant dense<0.000000e+00> : vector<8x512xf32>
    %75 = tpu.matmul %72, %74, %cst_49 {dimension_numbers = #tpu.dot_dimension_numbers<[1], [0], [0], [1], [0, 0, 1, 1], [], []>} : vector<8x256xbf16>, vector<256x512xbf16>, vector<8x512xf32> -> vector<8x512xf32>
    %c2_50 = arith.constant 2 : index
    %c0_51 = arith.constant 0 : index
    %c0_52 = arith.constant 0 : index
    %76 = vector.load %arg4[%c2_50, %c0_51, %c0_52] : memref<3x1x512xf32, #tpu.memory_space<vmem>>, vector<1x1x512xf32>
    %77 = vector.shape_cast %76 : vector<1x1x512xf32> to vector<1x512xf32>
    %78 = vector.broadcast %77 : vector<1x512xf32> to vector<8x512xf32>
    %79 = arith.addf %75, %78 : vector<8x512xf32>
    %80 = vector.extract_strided_slice %79 {offsets = [0, 256], sizes = [8, 128], strides = [1, 1]} : vector<8x512xf32> to vector<8x128xf32>
    %cst_53 = arith.constant 5.000000e-01 : f32
    %81 = vector.broadcast %cst_53 : f32 to vector<8x128xf32>
    %82 = arith.mulf %81, %80 : vector<8x128xf32>
    %83 = math.tanh %82 : vector<8x128xf32>
    %cst_54 = arith.constant 1.000000e+00 : f32
    %84 = vector.broadcast %cst_54 : f32 to vector<8x128xf32>
    %85 = arith.addf %84, %83 : vector<8x128xf32>
    %cst_55 = arith.constant 5.000000e-01 : f32
    %86 = vector.broadcast %cst_55 : f32 to vector<8x128xf32>
    %87 = arith.mulf %86, %85 : vector<8x128xf32>
    %88 = vector.extract_strided_slice %79 {offsets = [0, 0], sizes = [8, 128], strides = [1, 1]} : vector<8x512xf32> to vector<8x128xf32>
    %89 = math.tanh %88 : vector<8x128xf32>
    %cst_56 = arith.constant 1.000000e+00 : f32
    %90 = vector.broadcast %cst_56 : f32 to vector<8x128xf32>
    %91 = arith.subf %90, %87 : vector<8x128xf32>
    %92 = arith.mulf %89, %91 : vector<8x128xf32>
    %93 = vector.extract_strided_slice %79 {offsets = [0, 128], sizes = [8, 128], strides = [1, 1]} : vector<8x512xf32> to vector<8x128xf32>
    %94 = math.tanh %93 : vector<8x128xf32>
    %95 = arith.mulf %94, %87 : vector<8x128xf32>
    %96 = arith.addf %92, %95 : vector<8x128xf32>
    %c0_57 = arith.constant 0 : index
    %c256_58 = arith.constant 256 : index
    %97 = vector.load %arg6[%c0_57, %c256_58] : memref<8x384xf32, #tpu.memory_space<vmem>>, vector<8x128xf32>
    tpu.vector_store %arg6[%c0_57, %c256_58], %96 {strides = array<i32>} : memref<8x384xf32, #tpu.memory_space<vmem>>, vector<8x128xf32>,
    %98 = vector.extract_strided_slice %79 {offsets = [0, 384], sizes = [8, 128], strides = [1, 1]} : vector<8x512xf32> to vector<8x128xf32>
    %99 = arith.addf %98, %96 : vector<8x128xf32>
    %100 = math.tanh %99 : vector<8x128xf32>
    %c0_59 = arith.constant 0 : index
    %c0_60 = arith.constant 0 : index
    %101 = vector.load %arg5[%c0_59, %c0_60] : memref<8x128xf32, #tpu.memory_space<vmem>>, vector<8x128xf32>
    tpu.vector_store %arg5[%c0_59, %c0_60], %100 {strides = array<i32>} : memref<8x128xf32, #tpu.memory_space<vmem>>, vector<8x128xf32>,
    return
  }
  func.func @transform_0(%arg0: i32) -> (i32, i32) {
    %c0_i32 = arith.constant 0 : i32
    %c0_i32_0 = arith.constant 0 : i32
    return %arg0, %c0_i32 : i32, i32
  }
  func.func @transform_1(%arg0: i32) -> (i32, i32) {
    %c0_i32 = arith.constant 0 : i32
    %c0_i32_0 = arith.constant 0 : i32
    return %arg0, %c0_i32 : i32, i32
  }
  func.func @transform_2(%arg0: i32) -> (i32, i32, i32) {
    %c0_i32 = arith.constant 0 : i32
    %c0_i32_0 = arith.constant 0 : i32
    %c0_i32_1 = arith.constant 0 : i32
    %c0_i32_2 = arith.constant 0 : i32
    return %c0_i32, %c0_i32_0, %c0_i32_1 : i32, i32, i32
  }
  func.func @transform_3(%arg0: i32) -> (i32, i32, i32) {
    %c0_i32 = arith.constant 0 : i32
    %c0_i32_0 = arith.constant 0 : i32
    %c0_i32_1 = arith.constant 0 : i32
    %c0_i32_2 = arith.constant 0 : i32
    return %c0_i32, %c0_i32_0, %c0_i32_1 : i32, i32, i32
  }
  func.func @transform_4(%arg0: i32) -> (i32, i32) {
    %c0_i32 = arith.constant 0 : i32
    %c0_i32_0 = arith.constant 0 : i32
    return %arg0, %c0_i32 : i32, i32
  }
  func.func @transform_5(%arg0: i32) -> (i32, i32) {
    %c0_i32 = arith.constant 0 : i32
    %c0_i32_0 = arith.constant 0 : i32
    return %arg0, %c0_i32 : i32, i32
  }
}

</mosaic_0001>

<bundles_post_ra>
// kernel: tpu_custom_call.1
= control target key start
LH: loop header
LB: loop body
LE: loop exit
PB: predicated region body
PF: predicated region fallthrough
CT: control target
= control target key end

     0   :  { %11 = vsyncpa [#allocation4], 0  ;;  %s2377_s0 = inlined_call_operand.vmem [shape: f32[8,128], index: 0, kind: input, shape index: {}]   ;;  %s2378_s1 = inlined_call_operand.hbm [shape: f32[8,384], index: 1, kind: input, shape index: {}, may-alias: {1,5}]   ;;  %s2379_s2 = inlined_call_operand.hbm [shape: bf16[3,256,512], index: 2, kind: input, shape index: {}]   ;;  %s2380_s3 = inlined_call_operand.vmem [shape: f32[3,1,512], index: 3, kind: input, shape index: {}]   ;;  %s2381_s4 = inlined_call_operand.hbm [shape: f32[8,128], index: 4, kind: output, shape index: {0}]   ;;  %s2382_s5 = inlined_call_operand.hbm [shape: f32[8,384], index: 5, kind: output, shape index: {1}, may-alias: {1,5}]  }
   0x1   :  { %12 = vsyncpa [#allocation7], 0 }
   0x2   :  { %13 = vsyncpa [#allocation5], 0 }
   0x3   :  { %14 = vsyncpa [#allocation10], 0  ;;  %s2254_s18 = smov [#allocation3]   ;;  %s2255_s20 = smov [#allocation6]  }
   0x4   :  { %s23_s19 = sshll.u32 %s2254_s18, 4  ;;  %s32_s21 = sshll.u32 %s2255_s20, 4  ;;  %s24_s19 = int_to_ptr.vmem [resolvable:$true] %s23_s19  ;;  %s2290_s21 = int_to_ptr.vmem [resolvable:$true] %s32_s21 }
   0x5   :  { %s2158_s24 = scalar_lea.hbm %s2378_s1, 384 }
   0x6   :  { %p2159_p0 = scmp.ne.s32.totalorder %s2378_s1, %s2158_s24  ;;  %p2162_p1 = scmp.lt.u32.totalorder %s2158_s24, %s2378_s1 }
   0x8   :  { %p2164_p2 = pnand %p2162_p1, %p2159_p0 }
   0xa   :  { %2167 = shalt.err (!%p2164_p2)
}
   0xb   :  { %s2168_s29 = scalar_lea.vmem %s24_s19, 384  ;;  %p2173_p4 = scmp.lt.s32.totalorder %s24_s19, %s24_s19 }
   0xc   :  { %p2169_p3 = scmp.ne.s32.totalorder %s24_s19, %s2168_s29  ;;  %p2174_p5 = scmp.lt.s32.totalorder %s2168_s29, %s2168_s29 }
   0xe   :  { %p2175_p6 = por %p2174_p5, %p2173_p4 }
  0x10   :  { %p2176_p7 = pnand %p2175_p6, %p2169_p3 }
  0x12   :  { %2179 = shalt.err (!%p2176_p7)
}
  0x13   :  { %26 = dma.hbm_to_vmem [thread:$0]  %s2378_s1, 384, %s24_s19, [#allocation4]  }
  0x14   :  { %s2180_s9 = scalar_lea.hbm %s2379_s2, 24576 }
  0x15   :  { %p2181_p8 = scmp.ne.s32.totalorder %s2379_s2, %s2180_s9  ;;  %p2184_p9 = scmp.lt.u32.totalorder %s2180_s9, %s2379_s2 }
  0x17   :  { %p2186_p10 = pnand %p2184_p9, %p2181_p8 }
  0x19   :  { %2189 = shalt.err (!%p2186_p10)
}
  0x1a   :  { %s2190_s14 = scalar_lea.vmem %s2290_s21, 24576  ;;  %p2195_p12 = scmp.lt.s32.totalorder %s2290_s21, %s2290_s21 }
  0x1b   :  { %p2191_p11 = scmp.ne.s32.totalorder %s2290_s21, %s2190_s14  ;;  %p2196_p13 = scmp.lt.s32.totalorder %s2190_s14, %s2190_s14 }
  0x1d   :  { %p2197_p0 = por %p2196_p13, %p2195_p12 }
  0x1f   :  { %p2198_p1 = pnand %p2197_p0, %p2191_p11 }
  0x21   :  { %2201 = shalt.err (!%p2198_p1)
}
  0x22   :  { %s2256_s1 = smov 256   ;;  %s2257_s15 = smov 16  }
  0x23   :  { %38 = dma.hbm_to_vmem [thread:$0]  %s2379_s2, 24576, %s2290_s21, [#allocation7], %s2256_s1, %s2256_s1, %s2257_s15  }
  0x24   :  { %2246 = dma.done.wait [#allocation4], 384  }
  0x25   :  { %2247 = vsyncadd [#allocation4], 4294966912 }
  0x26   :  { %2248 = dma.done.wait [#allocation7], 24576  }
  0x27   :  { %2249 = vsyncadd [#allocation7], 4294942720  ;;  %v1850_v0 = vld [vmem:[#allocation6 + $0xc] ss:$16 sps:$4 sm:$0xff]   ;;  %v1852_v1 = vld [vmem:[#allocation6 + $0x8] ss:$16 sps:$4 sm:$0xff]  }
  0x28   :  { %508 = vmatprep.subr.bf16.mxu1 %v1850_v0  ;;  %v1853_v2 = vld [vmem:[#allocation6 + $0x4] ss:$16 sps:$4 sm:$0xff]   ;;  %v1855_v3 = vld [vmem:[#allocation6 + $0x2c] ss:$16 sps:$4 sm:$0xff]   ;;  %v1857_v4 = vld [vmem:[#allocation6] ss:$16 sps:$4 sm:$0xff]  }
  0x29   :  { %509 = vmatpush1.bf16.msra.mxu1 %v1852_v1  ;;  %v1858_v5 = vld [vmem:[#allocation6 + $0x28] ss:$16 sps:$4 sm:$0xff]   ;;  %467 = vmatprep.subr.bf16.mxu0 %v1853_v2  ;;  %v1859_v6 = vld [vmem:[#allocation6 + $0x24] ss:$16 sps:$4 sm:$0xff]   ;;  %v1861_v7 = vld [vmem:[#allocation6 + $0x4c] ss:$16 sps:$4 sm:$0xff]  }
  0x2a   :  { %510 = vmatprep.subr.bf16.mxu1 %v1855_v3  ;;  %468 = vmatpush1.bf16.msra.mxu0 %v1857_v4  ;;  %v1863_v8 = vld [vmem:[#allocation6 + $0x20] ss:$16 sps:$4 sm:$0xff]   ;;  %v1864_v9 = vld [vmem:[#allocation6 + $0x48] ss:$16 sps:$4 sm:$0xff]   ;;  %v1865_v10 = vld [vmem:[#allocation6 + $0x44] ss:$16 sps:$4 sm:$0xff]  }
  0x2b   :  { %469 = vmatprep.subr.bf16.mxu0 %v1859_v6  ;;  %v1867_v11 = vld [vmem:[#allocation6 + $0x6c] ss:$16 sps:$4 sm:$0xff]   ;;  %v1869_v12 = vld [vmem:[#allocation6 + $0x40] ss:$16 sps:$4 sm:$0xff]   ;;  %v1871_v13 = vld [vmem:[#allocation6 + $0x64] ss:$16 sps:$4 sm:$0xff]  }
  0x2c   :  { %v1870_v14 = vld [vmem:[#allocation6 + $0x68] ss:$16 sps:$4 sm:$0xff]   ;;  %v1873_v15 = vld [vmem:[#allocation6 + $0x8c] ss:$16 sps:$4 sm:$0xff]   ;;  %v1875_v16 = vld [vmem:[#allocation6 + $0x60] ss:$16 sps:$4 sm:$0xff]  }
  0x2d   :  { %511 = vmatpush1.bf16.msra.mxu1 %v1858_v5  ;;  %v1877_v17 = vld [vmem:[#allocation6 + $0x84] ss:$16 sps:$4 sm:$0xff]   ;;  %v1876_v18 = vld [vmem:[#allocation6 + $0x88] ss:$16 sps:$4 sm:$0xff]   ;;  %v1879_v19 = vld [vmem:[#allocation6 + $0xac] ss:$16 sps:$4 sm:$0xff]  }
  0x2e   :  { %512 = vmatprep.subr.bf16.mxu1 %v1861_v7  ;;  %470 = vmatpush1.bf16.msra.mxu0 %v1863_v8  ;;  %v1881_v20 = vld [vmem:[#allocation6 + $0x80] ss:$16 sps:$4 sm:$0xff]   ;;  %v1883_v21 = vld [vmem:[#allocation6 + $0xa4] ss:$16 sps:$4 sm:$0xff]   ;;  %v1882_v22 = vld [vmem:[#allocation6 + $0xa8] ss:$16 sps:$4 sm:$0xff]  }
  0x2f   :  { %471 = vmatprep.subr.bf16.mxu0 %v1865_v10  ;;  %v1885_v23 = vld [vmem:[#allocation6 + $0xcc] ss:$16 sps:$4 sm:$0xff]   ;;  %v1887_v24 = vld [vmem:[#allocation6 + $0xa0] ss:$16 sps:$4 sm:$0xff]   ;;  %v1889_v25 = vld [vmem:[#allocation6 + $0xc4] ss:$16 sps:$4 sm:$0xff]  }
  0x30   :  { %v1888_v26 = vld [vmem:[#allocation6 + $0xc8] ss:$16 sps:$4 sm:$0xff]   ;;  %v1891_v27 = vld [vmem:[#allocation6 + $0xec] ss:$16 sps:$4 sm:$0xff]   ;;  %v1893_v28 = vld [vmem:[#allocation6 + $0xc0] ss:$16 sps:$4 sm:$0xff]  }
  0x31   :  { %513 = vmatpush1.bf16.msra.mxu1 %v1864_v9  ;;  %v1895_v29 = vld [vmem:[#allocation6 + $0xe4] ss:$16 sps:$4 sm:$0xff]   ;;  %v1894_v30 = vld [vmem:[#allocation6 + $0xe8] ss:$16 sps:$4 sm:$0xff]   ;;  %v1897_v31 = vld [vmem:[#allocation6 + $0x10c] ss:$16 sps:$4 sm:$0xff]  }
  0x32   :  { %514 = vmatprep.subr.bf16.mxu1 %v1867_v11  ;;  %472 = vmatpush1.bf16.msra.mxu0 %v1869_v12  ;;  %v1899_v32 = vld [vmem:[#allocation6 + $0xe0] ss:$16 sps:$4 sm:$0xff]   ;;  %v1901_v33 = vld [vmem:[#allocation6 + $0x104] ss:$16 sps:$4 sm:$0xff]   ;;  %v1900_v34 = vld [vmem:[#allocation6 + $0x108] ss:$16 sps:$4 sm:$0xff]  }
  0x33   :  { %473 = vmatprep.subr.bf16.mxu0 %v1871_v13  ;;  %v1903_v35 = vld [vmem:[#allocation6 + $0x12c] ss:$16 sps:$4 sm:$0xff]   ;;  %v1905_v36 = vld [vmem:[#allocation6 + $0x100] ss:$16 sps:$4 sm:$0xff]   ;;  %v1907_v37 = vld [vmem:[#allocation6 + $0x124] ss:$16 sps:$4 sm:$0xff]  }
  0x34   :  { %v1906_v38 = vld [vmem:[#allocation6 + $0x128] ss:$16 sps:$4 sm:$0xff]   ;;  %v1909_v39 = vld [vmem:[#allocation6 + $0x14c] ss:$16 sps:$4 sm:$0xff]   ;;  %v1911_v40 = vld [vmem:[#allocation6 + $0x120] ss:$16 sps:$4 sm:$0xff]  }
  0x35   :  { %515 = vmatpush1.bf16.msra.mxu1 %v1870_v14  ;;  %v1913_v41 = vld [vmem:[#allocation6 + $0x144] ss:$16 sps:$4 sm:$0xff]   ;;  %v1912_v42 = vld [vmem:[#allocation6 + $0x148] ss:$16 sps:$4 sm:$0xff]   ;;  %v1915_v43 = vld [vmem:[#allocation6 + $0x16c] ss:$16 sps:$4 sm:$0xff]  }
  0x36   :  { %516 = vmatprep.subr.bf16.mxu1 %v1873_v15  ;;  %474 = vmatpush1.bf16.msra.mxu0 %v1875_v16  ;;  %v1917_v44 = vld [vmem:[#allocation6 + $0x140] ss:$16 sps:$4 sm:$0xff]   ;;  %v50_v45 = vld [vmem:[#allocation3] sm:$0xff]  ;;  %v1919_v46 = vld [vmem:[#allocation6 + $0x164] ss:$16 sps:$4 sm:$0xff]  }
  0x37   :  { %475 = vmatprep.subr.bf16.mxu0 %v1877_v17  ;;  %v1839_v47 = vpack.c.bf16 %v50_v45, %v50_v45  ;;  %v1918_v48 = vld [vmem:[#allocation6 + $0x168] ss:$16 sps:$4 sm:$0xff]   ;;  %v1921_v49 = vld [vmem:[#allocation6 + $0x18c] ss:$16 sps:$4 sm:$0xff]   ;;  %v1923_v50 = vld [vmem:[#allocation6 + $0x160] ss:$16 sps:$4 sm:$0xff]  }
  0x38   :  { %v1925_v51 = vld [vmem:[#allocation6 + $0x184] ss:$16 sps:$4 sm:$0xff]   ;;  %v1924_v52 = vld [vmem:[#allocation6 + $0x188] ss:$16 sps:$4 sm:$0xff]   ;;  %v1927_v53 = vld [vmem:[#allocation6 + $0x1ac] ss:$16 sps:$4 sm:$0xff]  }
  0x39   :  { %517 = vmatpush1.bf16.msra.mxu1 %v1876_v18  ;;  %540 = vmatprep.mubr.bf16.mxu1 %v1839_v47  ;;  %v1929_v54 = vld [vmem:[#allocation6 + $0x180] ss:$16 sps:$4 sm:$0xff]   ;;  %v1931_v55 = vld [vmem:[#allocation6 + $0x1a4] ss:$16 sps:$4 sm:$0xff]   ;;  %v1930_v56 = vld [vmem:[#allocation6 + $0x1a8] ss:$16 sps:$4 sm:$0xff]  }
  0x3a   :  { %518 = vmatprep.subr.bf16.mxu1 %v1879_v19  ;;  %476 = vmatpush1.bf16.msra.mxu0 %v1881_v20  ;;  %v1933_v57 = vld [vmem:[#allocation6 + $0x1cc] ss:$16 sps:$4 sm:$0xff]   ;;  %v1935_v58 = vld [vmem:[#allocation6 + $0x1a0] ss:$16 sps:$4 sm:$0xff]   ;;  %v1937_v59 = vld [vmem:[#allocation6 + $0x1c4] ss:$16 sps:$4 sm:$0xff]  }
  0x3b   :  { %477 = vmatprep.subr.bf16.mxu0 %v1883_v21  ;;  %499 = vmatprep.mubr.bf16.mxu0 %v1839_v47  ;;  %v1936_v60 = vld [vmem:[#allocation6 + $0x1c8] ss:$16 sps:$4 sm:$0xff]   ;;  %v1939_v61 = vld [vmem:[#allocation6 + $0x1ec] ss:$16 sps:$4 sm:$0xff]   ;;  %v1941_v62 = vld [vmem:[#allocation6 + $0x1c0] ss:$16 sps:$4 sm:$0xff]  }
  0x3c   :  { %v1942_v63 = vld [vmem:[#allocation6 + $0x1e8] ss:$16 sps:$4 sm:$0xff]   ;;  %v1943_v0 = vld [vmem:[#allocation6 + $0x1e4] ss:$16 sps:$4 sm:$0xff]   ;;  %v1951_v2 = vld [vmem:[#allocation6 + $0x20c] ss:$16 sps:$4 sm:$0xff]  }
  0x3d   :  { %519 = vmatpush1.bf16.msra.mxu1 %v1882_v22  ;;  %v47_v1 = vld [vmem:[%s2377_s0] sm:$0xff]  ;;  %v1945_v3 = vld [vmem:[#allocation6 + $0x1e0] ss:$16 sps:$4 sm:$0xff]   ;;  %v1948_v5 = vld [vmem:[#allocation6 + $0x204] ss:$16 sps:$4 sm:$0xff]  }
  0x3e   :  { %520 = vmatprep.subr.bf16.mxu1 %v1885_v23  ;;  %478 = vmatpush1.bf16.msra.mxu0 %v1887_v24  ;;  %v1838_v4 = vpack.c.bf16 %v47_v1, %v47_v1  ;;  %v1949_v6 = vld [vmem:[#allocation6 + $0x208] ss:$16 sps:$4 sm:$0xff]   ;;  %v1957_v7 = vld [vmem:[#allocation6 + $0x22c] ss:$16 sps:$4 sm:$0xff]   ;;  %v1946_v8 = vld [vmem:[#allocation6 + $0x200] ss:$16 sps:$4 sm:$0xff]  }
  0x3f   :  { %479 = vmatprep.subr.bf16.mxu0 %v1889_v25  ;;  %v1954_v9 = vld [vmem:[#allocation6 + $0x224] ss:$16 sps:$4 sm:$0xff]   ;;  %v1952_v10 = vld [vmem:[#allocation6 + $0x220] ss:$16 sps:$4 sm:$0xff]   ;;  %v1955_v11 = vld [vmem:[#allocation6 + $0x228] ss:$16 sps:$4 sm:$0xff]  }
  0x40   :  { %v1963_v12 = vld [vmem:[#allocation6 + $0x24c] ss:$16 sps:$4 sm:$0xff]   ;;  %v1960_v13 = vld [vmem:[#allocation6 + $0x244] ss:$16 sps:$4 sm:$0xff]   ;;  %v1961_v14 = vld [vmem:[#allocation6 + $0x248] ss:$16 sps:$4 sm:$0xff]  }
  0x41   :  { %521 = vmatpush1.bf16.msra.mxu1 %v1888_v26  ;;  %v1969_v15 = vld [vmem:[#allocation6 + $0x26c] ss:$16 sps:$4 sm:$0xff]   ;;  %v1958_v16 = vld [vmem:[#allocation6 + $0x240] ss:$16 sps:$4 sm:$0xff]   ;;  %v1966_v17 = vld [vmem:[#allocation6 + $0x264] ss:$16 sps:$4 sm:$0xff]  }
  0x42   :  { %522 = vmatprep.subr.bf16.mxu1 %v1891_v27  ;;  %480 = vmatpush1.bf16.msra.mxu0 %v1893_v28  ;;  %v1967_v18 = vld [vmem:[#allocation6 + $0x268] ss:$16 sps:$4 sm:$0xff]   ;;  %v1975_v19 = vld [vmem:[#allocation6 + $0x28c] ss:$16 sps:$4 sm:$0xff]   ;;  %v1964_v20 = vld [vmem:[#allocation6 + $0x260] ss:$16 sps:$4 sm:$0xff]  }
  0x43   :  { %481 = vmatprep.subr.bf16.mxu0 %v1895_v29  ;;  %v1972_v21 = vld [vmem:[#allocation6 + $0x284] ss:$16 sps:$4 sm:$0xff]   ;;  %v1973_v22 = vld [vmem:[#allocation6 + $0x288] ss:$16 sps:$4 sm:$0xff]   ;;  %v1981_v23 = vld [vmem:[#allocation6 + $0x2ac] ss:$16 sps:$4 sm:$0xff]  }
  0x44   :  { %v1970_v24 = vld [vmem:[#allocation6 + $0x280] ss:$16 sps:$4 sm:$0xff]   ;;  %v1978_v25 = vld [vmem:[#allocation6 + $0x2a4] ss:$16 sps:$4 sm:$0xff]   ;;  %v1979_v26 = vld [vmem:[#allocation6 + $0x2a8] ss:$16 sps:$4 sm:$0xff]  }
  0x45   :  { %523 = vmatpush1.bf16.msra.mxu1 %v1894_v30  ;;  %v1987_v27 = vld [vmem:[#allocation6 + $0x2cc] ss:$16 sps:$4 sm:$0xff]   ;;  %v1976_v28 = vld [vmem:[#allocation6 + $0x2a0] ss:$16 sps:$4 sm:$0xff]   ;;  %v1984_v29 = vld [vmem:[#allocation6 + $0x2c4] ss:$16 sps:$4 sm:$0xff]  }
  0x46   :  { %524 = vmatprep.subr.bf16.mxu1 %v1897_v31  ;;  %482 = vmatpush1.bf16.msra.mxu0 %v1899_v32  ;;  %v1985_v30 = vld [vmem:[#allocation6 + $0x2c8] ss:$16 sps:$4 sm:$0xff]   ;;  %v1993_v31 = vld [vmem:[#allocation6 + $0x2ec] ss:$16 sps:$4 sm:$0xff]   ;;  %v1982_v32 = vld [vmem:[#allocation6 + $0x2c0] ss:$16 sps:$4 sm:$0xff]  }
  0x47   :  { %483 = vmatprep.subr.bf16.mxu0 %v1901_v33  ;;  %v1990_v33 = vld [vmem:[#allocation6 + $0x2e4] ss:$16 sps:$4 sm:$0xff]   ;;  %v2011_v45 = vld [vmem:[#allocation6 + $0x34c] ss:$16 sps:$4 sm:$0xff]   ;;  %v2009_v47 = vld [vmem:[#allocation6 + $0x348] ss:$16 sps:$4 sm:$0xff]  }
  0x48   :  { %v2041_v1 = vld [vmem:[#allocation6 + $0x3ec] ss:$16 sps:$4 sm:$0xff]  }
  0x49   :  { %525 = vmatpush1.bf16.msra.mxu1 %v1900_v34  ;;  %v1991_v34 = vld [vmem:[#allocation6 + $0x2e8] ss:$16 sps:$4 sm:$0xff]  }
  0x4a   :  { %526 = vmatprep.subr.bf16.mxu1 %v1903_v35  ;;  %484 = vmatpush1.bf16.msra.mxu0 %v1905_v36  ;;  %v1999_v35 = vld [vmem:[#allocation6 + $0x30c] ss:$16 sps:$4 sm:$0xff]   ;;  %v1988_v36 = vld [vmem:[#allocation6 + $0x2e0] ss:$16 sps:$4 sm:$0xff]  }
  0x4b   :  { %485 = vmatprep.subr.bf16.mxu0 %v1907_v37  ;;  %v1996_v37 = vld [vmem:[#allocation6 + $0x304] ss:$16 sps:$4 sm:$0xff]  }
  0x4d   :  { %527 = vmatpush1.bf16.msra.mxu1 %v1906_v38  ;;  %v1997_v38 = vld [vmem:[#allocation6 + $0x308] ss:$16 sps:$4 sm:$0xff]  }
  0x4e   :  { %528 = vmatprep.subr.bf16.mxu1 %v1909_v39  ;;  %486 = vmatpush1.bf16.msra.mxu0 %v1911_v40  ;;  %v1994_v39 = vld [vmem:[#allocation6 + $0x300] ss:$16 sps:$4 sm:$0xff]   ;;  %v2002_v40 = vld [vmem:[#allocation6 + $0x324] ss:$16 sps:$4 sm:$0xff]  }
  0x4f   :  { %487 = vmatprep.subr.bf16.mxu0 %v1913_v41  ;;  %v2005_v41 = vld [vmem:[#allocation6 + $0x32c] ss:$16 sps:$4 sm:$0xff]  }
  0x51   :  { %529 = vmatpush1.bf16.msra.mxu1 %v1912_v42  ;;  %v2000_v42 = vld [vmem:[#allocation6 + $0x320] ss:$16 sps:$4 sm:$0xff]  }
  0x52   :  { %530 = vmatprep.subr.bf16.mxu1 %v1915_v43  ;;  %488 = vmatpush1.bf16.msra.mxu0 %v1917_v44  ;;  %v2003_v43 = vld [vmem:[#allocation6 + $0x328] ss:$16 sps:$4 sm:$0xff]   ;;  %v2008_v44 = vld [vmem:[#allocation6 + $0x344] ss:$16 sps:$4 sm:$0xff]  }
  0x53   :  { %489 = vmatprep.subr.bf16.mxu0 %v1919_v46  ;;  %v2006_v46 = vld [vmem:[#allocation6 + $0x340] ss:$16 sps:$4 sm:$0xff]  }
  0x55   :  { %531 = vmatpush1.bf16.msra.mxu1 %v1918_v48  ;;  %v2014_v48 = vld [vmem:[#allocation6 + $0x364] ss:$16 sps:$4 sm:$0xff]  }
  0x56   :  { %532 = vmatprep.subr.bf16.mxu1 %v1921_v49  ;;  %490 = vmatpush1.bf16.msra.mxu0 %v1923_v50  ;;  %v2017_v49 = vld [vmem:[#allocation6 + $0x36c] ss:$16 sps:$4 sm:$0xff]   ;;  %v2012_v50 = vld [vmem:[#allocation6 + $0x360] ss:$16 sps:$4 sm:$0xff]  }
  0x57   :  { %491 = vmatprep.subr.bf16.mxu0 %v1925_v51  ;;  %v2015_v51 = vld [vmem:[#allocation6 + $0x368] ss:$16 sps:$4 sm:$0xff]  }
  0x59   :  { %533 = vmatpush1.bf16.msra.mxu1 %v1924_v52  ;;  %v2020_v52 = vld [vmem:[#allocation6 + $0x384] ss:$16 sps:$4 sm:$0xff]  }
  0x5a   :  { %534 = vmatprep.subr.bf16.mxu1 %v1927_v53  ;;  %492 = vmatpush1.bf16.msra.mxu0 %v1929_v54  ;;  %v2023_v53 = vld [vmem:[#allocation6 + $0x38c] ss:$16 sps:$4 sm:$0xff]   ;;  %v2018_v54 = vld [vmem:[#allocation6 + $0x380] ss:$16 sps:$4 sm:$0xff]  }
  0x5b   :  { %493 = vmatprep.subr.bf16.mxu0 %v1931_v55  ;;  %v2021_v55 = vld [vmem:[#allocation6 + $0x388] ss:$16 sps:$4 sm:$0xff]  }
  0x5d   :  { %535 = vmatpush1.bf16.msra.mxu1 %v1930_v56  ;;  %v2026_v56 = vld [vmem:[#allocation6 + $0x3a4] ss:$16 sps:$4 sm:$0xff]  }
  0x5e   :  { %536 = vmatprep.subr.bf16.mxu1 %v1933_v57  ;;  %494 = vmatpush1.bf16.msra.mxu0 %v1935_v58  ;;  %v2029_v57 = vld [vmem:[#allocation6 + $0x3ac] ss:$16 sps:$4 sm:$0xff]   ;;  %v2024_v58 = vld [vmem:[#allocation6 + $0x3a0] ss:$16 sps:$4 sm:$0xff]  }
  0x5f   :  { %495 = vmatprep.subr.bf16.mxu0 %v1937_v59  ;;  %v2027_v59 = vld [vmem:[#allocation6 + $0x3a8] ss:$16 sps:$4 sm:$0xff]  }
  0x61   :  { %537 = vmatpush1.bf16.msra.mxu1 %v1936_v60  ;;  %v2030_v60 = vld [vmem:[#allocation6 + $0x3c0] ss:$16 sps:$4 sm:$0xff]  }
  0x62   :  { %538 = vmatprep.subr.bf16.mxu1 %v1939_v61  ;;  %496 = vmatpush1.bf16.msra.mxu0 %v1941_v62  ;;  %v2032_v61 = vld [vmem:[#allocation6 + $0x3c4] ss:$16 sps:$4 sm:$0xff]   ;;  %v2033_v62 = vld [vmem:[#allocation6 + $0x3c8] ss:$16 sps:$4 sm:$0xff]  }
  0x63   :  { %497 = vmatprep.subr.bf16.mxu0 %v1943_v0  ;;  %v2038_v0 = vld [vmem:[#allocation6 + $0x3e4] ss:$16 sps:$4 sm:$0xff]  }
  0x65   :  { %539 = vmatpush1.bf16.msra.mxu1 %v1942_v63  ;;  %v2035_v63 = vld [vmem:[#allocation6 + $0x3cc] ss:$16 sps:$4 sm:$0xff]  }
  0x66   :  { %1023 = vmatprep.subr.bf16.mxu1 %v1951_v2  ;;  %498 = vmatpush1.bf16.msra.mxu0 %v1945_v3  ;;  %v563_v2 = vld [vmem:[#allocation3 + $0x8] sm:$0xff] }
  0x67   :  { %982 = vmatprep.subr.bf16.mxu0 %v1948_v5  ;;  %v2036_v3 = vld [vmem:[#allocation6 + $0x3e0] ss:$16 sps:$4 sm:$0xff]   ;;  %v2039_v5 = vld [vmem:[#allocation6 + $0x3e8] ss:$16 sps:$4 sm:$0xff]  }
  0x68   :  { %541 = vmatmul.mubr.bf16.vlgmr.msra.gmra.mrb[0].mxu1 %v1838_v4 }
  0x69   :  { %1024 = vmatpush1.bf16.msra.mxu1 %v1949_v6  ;;  %500 = vmatmul.mubr.bf16.vlgmr.msra.gmra.mrb[0].mxu0 %v1838_v4  ;;  %v1841_v4 = vpack.c.bf16 %v563_v2, %v563_v2  ;;  %v2044_v6 = vld [vmem:[#allocation6 + $0x404] ss:$16 sps:$4 sm:$0xff]   ;;  %v2083_v2 = vld [vmem:[#allocation6 + $0x4cc] ss:$16 sps:$4 sm:$0xff]  }
  0x6a   :  { %1025 = vmatprep.subr.bf16.mxu1 %v1957_v7  ;;  %983 = vmatpush1.bf16.msra.mxu0 %v1946_v8  ;;  %v2047_v7 = vld [vmem:[#allocation6 + $0x40c] ss:$16 sps:$4 sm:$0xff]   ;;  %v120_v8 = vlaneseq }
  0x6b   :  { %984 = vmatprep.subr.bf16.mxu0 %v1954_v9  ;;  %1014 = vmatprep.mubr.bf16.mxu0 %v1841_v4 }
  0x6c   :  { %1055 = vmatprep.mubr.bf16.mxu1 %v1841_v4  ;;  %v121_v9 = vshrl.u32 %v120_v8, 7  ;;  %v2081_v4 = vld [vmem:[#allocation6 + $0x4c8] ss:$16 sps:$4 sm:$0xff]  }
  0x6d   :  { %1026 = vmatpush1.bf16.msra.mxu1 %v1955_v11  ;;  %v118_v11 = vld [vmem:[%s2380_s3] sm:$0xf] }
  0x6e   :  { %1027 = vmatprep.subr.bf16.mxu1 %v1963_v12  ;;  %985 = vmatpush1.bf16.msra.mxu0 %v1952_v10  ;;  %v2324_v10 = vsub.s32 2, %v121_v9  ;;  %v2329_v12 = vsub.s32 1, %v121_v9  ;;  %v2087_v8 = vld [vmem:[#allocation6 + $0x4e8] ss:$16 sps:$4 sm:$0xff]  }
  0x6f   :  { %986 = vmatprep.subr.bf16.mxu0 %v1960_v13 }
  0x70   :  { %v131_v13 = vrot.slane %v118_v11, %v2324_v10 }
  0x71   :  { %1028 = vmatpush1.bf16.msra.mxu1 %v1961_v14  ;;  %v2332_v14 = vsub.s32 0, %v121_v9 }
  0x72   :  { %1029 = vmatprep.subr.bf16.mxu1 %v1969_v15  ;;  %987 = vmatpush1.bf16.msra.mxu0 %v1958_v16  ;;  %v127_v16 = vrot.slane %v118_v11, %v2329_v12 }
  0x73   :  { %988 = vmatprep.subr.bf16.mxu0 %v1966_v17 }
  0x75   :  { %1030 = vmatpush1.bf16.msra.mxu1 %v1967_v18 }
  0x76   :  { %1031 = vmatprep.subr.bf16.mxu1 %v1975_v19  ;;  %989 = vmatpush1.bf16.msra.mxu0 %v1964_v20  ;;  %v123_v19 = vrot.slane %v118_v11, %v2332_v14 }
  0x77   :  { %990 = vmatprep.subr.bf16.mxu0 %v1972_v21 }
  0x79   :  { %1032 = vmatpush1.bf16.msra.mxu1 %v1973_v22 }
  0x7a   :  { %1033 = vmatprep.subr.bf16.mxu1 %v1981_v23  ;;  %991 = vmatpush1.bf16.msra.mxu0 %v1970_v24 }
  0x7b   :  { %992 = vmatprep.subr.bf16.mxu0 %v1978_v25 }
  0x7d   :  { %1034 = vmatpush1.bf16.msra.mxu1 %v1979_v26 }
  0x7e   :  { %1035 = vmatprep.subr.bf16.mxu1 %v1987_v27  ;;  %993 = vmatpush1.bf16.msra.mxu0 %v1976_v28 }
  0x7f   :  { %994 = vmatprep.subr.bf16.mxu0 %v1984_v29 }
  0x81   :  { %1036 = vmatpush1.bf16.msra.mxu1 %v1985_v30 }
  0x82   :  { %1037 = vmatprep.subr.bf16.mxu1 %v1993_v31  ;;  %995 = vmatpush1.bf16.msra.mxu0 %v1982_v32  ;;  %v2336_v31 = vsub.s32 3, %v121_v9  ;;  %v2092_v9 = vld [vmem:[#allocation6 + $0x504] ss:$16 sps:$4 sm:$0xff]  }
  0x83   :  { %996 = vmatprep.subr.bf16.mxu0 %v1990_v33 }
  0x85   :  { %1038 = vmatpush1.bf16.msra.mxu1 %v1991_v34 }
  0x86   :  { %1039 = vmatprep.subr.bf16.mxu1 %v1999_v35  ;;  %997 = vmatpush1.bf16.msra.mxu0 %v1988_v36  ;;  %v135_v36 = vrot.slane %v118_v11, %v2336_v31  ;;  %v2095_v11 = vld [vmem:[#allocation6 + $0x50c] ss:$16 sps:$4 sm:$0xff]  }
  0x87   :  { %998 = vmatprep.subr.bf16.mxu0 %v1996_v37 }
  0x89   :  { %1040 = vmatpush1.bf16.msra.mxu1 %v1997_v38 }
  0x8a   :  { %999 = vmatpush1.bf16.msra.mxu0 %v1994_v39  ;;  %1041 = vmatprep.subr.bf16.mxu1 %v2005_v41 }
  0x8b   :  { %1000 = vmatprep.subr.bf16.mxu0 %v2002_v40 }
  0x8d   :  { %1042 = vmatpush1.bf16.msra.mxu1 %v2003_v43  ;;  %v2045_v43 = vld [vmem:[#allocation6 + $0x408] ss:$16 sps:$4 sm:$0xff]  }
  0x8e   :  { %1001 = vmatpush1.bf16.msra.mxu0 %v2000_v42  ;;  %1043 = vmatprep.subr.bf16.mxu1 %v2011_v45  ;;  %v2042_v42 = vld [vmem:[#allocation6 + $0x400] ss:$16 sps:$4 sm:$0xff]   ;;  %v2050_v45 = vld [vmem:[#allocation6 + $0x424] ss:$16 sps:$4 sm:$0xff]  }
  0x8f   :  { %1002 = vmatprep.subr.bf16.mxu0 %v2008_v44 }
  0x91   :  { %1044 = vmatpush1.bf16.msra.mxu1 %v2009_v47  ;;  %v2048_v47 = vld [vmem:[#allocation6 + $0x420] ss:$16 sps:$4 sm:$0xff]  }
  0x92   :  { %1003 = vmatpush1.bf16.msra.mxu0 %v2006_v46  ;;  %1045 = vmatprep.subr.bf16.mxu1 %v2017_v49  ;;  %v2053_v46 = vld [vmem:[#allocation6 + $0x42c] ss:$16 sps:$4 sm:$0xff]   ;;  %v2056_v49 = vld [vmem:[#allocation6 + $0x444] ss:$16 sps:$4 sm:$0xff]  }
  0x93   :  { %1004 = vmatprep.subr.bf16.mxu0 %v2014_v48  ;;  %v2051_v48 = vld [vmem:[#allocation6 + $0x428] ss:$16 sps:$4 sm:$0xff]  }
  0x95   :  { %1046 = vmatpush1.bf16.msra.mxu1 %v2015_v51  ;;  %v2054_v51 = vld [vmem:[#allocation6 + $0x440] ss:$16 sps:$4 sm:$0xff]  }
  0x96   :  { %1005 = vmatpush1.bf16.msra.mxu0 %v2012_v50  ;;  %1047 = vmatprep.subr.bf16.mxu1 %v2023_v53  ;;  %v2059_v50 = vld [vmem:[#allocation6 + $0x44c] ss:$16 sps:$4 sm:$0xff]   ;;  %v2062_v53 = vld [vmem:[#allocation6 + $0x464] ss:$16 sps:$4 sm:$0xff]  }
  0x97   :  { %1006 = vmatprep.subr.bf16.mxu0 %v2020_v52  ;;  %v2057_v52 = vld [vmem:[#allocation6 + $0x448] ss:$16 sps:$4 sm:$0xff]  }
  0x99   :  { %1048 = vmatpush1.bf16.msra.mxu1 %v2021_v55  ;;  %v2060_v55 = vld [vmem:[#allocation6 + $0x460] ss:$16 sps:$4 sm:$0xff]  }
  0x9a   :  { %1007 = vmatpush1.bf16.msra.mxu0 %v2018_v54  ;;  %1049 = vmatprep.subr.bf16.mxu1 %v2029_v57  ;;  %v2065_v54 = vld [vmem:[#allocation6 + $0x46c] ss:$16 sps:$4 sm:$0xff]   ;;  %v2068_v57 = vld [vmem:[#allocation6 + $0x484] ss:$16 sps:$4 sm:$0xff]  }
  0x9b   :  { %1008 = vmatprep.subr.bf16.mxu0 %v2026_v56  ;;  %v2063_v56 = vld [vmem:[#allocation6 + $0x468] ss:$16 sps:$4 sm:$0xff]  }
  0x9d   :  { %1050 = vmatpush1.bf16.msra.mxu1 %v2027_v59  ;;  %v2066_v59 = vld [vmem:[#allocation6 + $0x480] ss:$16 sps:$4 sm:$0xff]  }
  0x9e   :  { %1009 = vmatpush1.bf16.msra.mxu0 %v2024_v58  ;;  %1051 = vmatprep.subr.bf16.mxu1 %v2035_v63  ;;  %v2071_v58 = vld [vmem:[#allocation6 + $0x48c] ss:$16 sps:$4 sm:$0xff]   ;;  %v2072_v63 = vld [vmem:[#allocation6 + $0x4a0] ss:$16 sps:$4 sm:$0xff]  }
  0x9f   :  { %1010 = vmatprep.subr.bf16.mxu0 %v2032_v61  ;;  %v2074_v61 = vld [vmem:[#allocation6 + $0x4a4] ss:$16 sps:$4 sm:$0xff]  }
  0xa1   :  { %1052 = vmatpush1.bf16.msra.mxu1 %v2033_v62  ;;  %v2077_v62 = vld [vmem:[#allocation6 + $0x4ac] ss:$16 sps:$4 sm:$0xff]  }
  0xa2   :  { %1011 = vmatpush1.bf16.msra.mxu0 %v2030_v60  ;;  %1053 = vmatprep.subr.bf16.mxu1 %v2041_v1  ;;  %v2069_v60 = vld [vmem:[#allocation6 + $0x488] ss:$16 sps:$4 sm:$0xff]   ;;  %v2080_v1 = vld [vmem:[#allocation6 + $0x4c4] ss:$16 sps:$4 sm:$0xff]  }
  0xa3   :  { %1012 = vmatprep.subr.bf16.mxu0 %v2038_v0  ;;  %v2075_v0 = vld [vmem:[#allocation6 + $0x4a8] ss:$16 sps:$4 sm:$0xff]  }
  0xa5   :  { %1054 = vmatpush1.bf16.msra.mxu1 %v2039_v5  ;;  %v2086_v5 = vld [vmem:[#allocation6 + $0x4e4] ss:$16 sps:$4 sm:$0xff]  }
  0xa6   :  { %1013 = vmatpush1.bf16.msra.mxu0 %v2036_v3  ;;  %1538 = vmatprep.subr.bf16.mxu1 %v2047_v7  ;;  %v2078_v3 = vld [vmem:[#allocation6 + $0x4c0] ss:$16 sps:$4 sm:$0xff]  }
  0xa7   :  { %1497 = vmatprep.subr.bf16.mxu0 %v2044_v6  ;;  %v2089_v6 = vld [vmem:[#allocation6 + $0x4ec] ss:$16 sps:$4 sm:$0xff]   ;;  %v2084_v7 = vld [vmem:[#allocation6 + $0x4e0] ss:$16 sps:$4 sm:$0xff]  }
 0x13b   :  { %v542_v15 = vpop.f32.mrb[0].mxu1 }
 0x13c   :  { %v543_v17 = vadd.f32 %v542_v15, %v131_v13  ;;  %v544_v18 = vpop.f32.mrb[1].mxu1  ;;  %v501_v21 = vpop.f32.mrb[0].mxu0  ;;  %v2090_v13 = vld [vmem:[#allocation6 + $0x500] ss:$16 sps:$4 sm:$0xff]   ;;  %v2093_v15 = vld [vmem:[#allocation6 + $0x508] ss:$16 sps:$4 sm:$0xff]  }
 0x13d   :  { %v546_v20 = vpop.f32.mrb[2].mxu1  ;;  %v503_v24 = vpop.f32.mrb[1].mxu0  ;;  %v502_v27 = vadd.f32 %v501_v21, %v123_v19  ;;  %v545_v39 = vadd.f32 %v544_v18, %v135_v36  ;;  %v2096_v18 = vld [vmem:[#allocation6 + $0x520] ss:$16 sps:$4 sm:$0xff]   ;;  %v2099_v19 = vld [vmem:[#allocation6 + $0x528] ss:$16 sps:$4 sm:$0xff]  }
 0x13e   :  { %v549_v22 = vmul.f32 0.5, %v543_v17  ;;  %v547_v23 = vpop.f32.mrb[3].mxu1  ;;  %v504_v25 = vadd.f32 %v503_v24, %v127_v16  ;;  %v505_v26 = vpop.f32.mrb[2].mxu0  ;;  %v2098_v16 = vld [vmem:[#allocation6 + $0x524] ss:$16 sps:$4 sm:$0xff]  }
 0x13f   :  { %v506_v28 = vpop.f32.mrb[3].mxu0  ;;  %v2101_v17 = vld [vmem:[#allocation6 + $0x52c] ss:$16 sps:$4 sm:$0xff]   ;;  %v2104_v20 = vld [vmem:[#allocation6 + $0x544] ss:$16 sps:$4 sm:$0xff]  }
 0x140   :  { %2138 = vtanh.f32 %v549_v22  ;;  %v2107_v21 = vld [vmem:[#allocation6 + $0x54c] ss:$16 sps:$4 sm:$0xff]   ;;  %v2102_v22 = vld [vmem:[#allocation6 + $0x540] ss:$16 sps:$4 sm:$0xff]   ;;  %v2105_v23 = vld [vmem:[#allocation6 + $0x548] ss:$16 sps:$4 sm:$0xff]  }
 0x141   :  { %2140 = vtanh.f32 %v504_v25  ;;  %v2110_v24 = vld [vmem:[#allocation6 + $0x564] ss:$16 sps:$4 sm:$0xff]   ;;  %v2113_v25 = vld [vmem:[#allocation6 + $0x56c] ss:$16 sps:$4 sm:$0xff]   ;;  %v2108_v26 = vld [vmem:[#allocation6 + $0x560] ss:$16 sps:$4 sm:$0xff]  }
 0x142   :  { %2142 = vtanh.f32 %v502_v27  ;;  %v2111_v27 = vld [vmem:[#allocation6 + $0x568] ss:$16 sps:$4 sm:$0xff]   ;;  %v2116_v28 = vld [vmem:[#allocation6 + $0x584] ss:$16 sps:$4 sm:$0xff]  }
 0x143   :  { %v2123_v36 = vld [vmem:[#allocation6 + $0x5a8] ss:$16 sps:$4 sm:$0xff]  }
 0x14a   :  { %v2139_v29 = vpop.eup %2138 }
 0x14b   :  { %v551_v30 = vadd.f32 1.0, %v2139_v29  ;;  %v2141_v32 = vpop.eup %2140  ;;  %v2119_v29 = vld [vmem:[#allocation6 + $0x58c] ss:$16 sps:$4 sm:$0xff]  }
 0x14c   :  { %v2143_v34 = vpop.eup %2142 }
 0x14d   :  { %v552_v33 = vmul.f32 0.5, %v551_v30  ;;  %v2114_v30 = vld [vmem:[#allocation6 + $0x580] ss:$16 sps:$4 sm:$0xff]  }
 0x14f   :  { %v554_v35 = vsub.f32 1.0, %v552_v33  ;;  %v557_v37 = vmul.f32 %v2141_v32, %v552_v33  ;;  %v2117_v32 = vld [vmem:[#allocation6 + $0x588] ss:$16 sps:$4 sm:$0xff]   ;;  %v2122_v33 = vld [vmem:[#allocation6 + $0x5a4] ss:$16 sps:$4 sm:$0xff]  }
 0x151   :  { %v555_v38 = vmul.f32 %v2143_v34, %v554_v35  ;;  %v2125_v34 = vld [vmem:[#allocation6 + $0x5ac] ss:$16 sps:$4 sm:$0xff]   ;;  %v2120_v35 = vld [vmem:[#allocation6 + $0x5a0] ss:$16 sps:$4 sm:$0xff]  }
 0x153   :  { %v558_v40 = vadd.f32 %v557_v37, %v555_v38  ;;  %v2128_v37 = vld [vmem:[#allocation6 + $0x5c4] ss:$16 sps:$4 sm:$0xff]   ;;  %v2131_v38 = vld [vmem:[#allocation6 + $0x5cc] ss:$16 sps:$4 sm:$0xff]  }
 0x155   :  { %v560_v41 = vadd.f32 %v558_v40, %v545_v39  ;;  %559 = vst [vmem:[#allocation9] sm:$0xff] %v558_v40  ;;  %v2126_v39 = vld [vmem:[#allocation6 + $0x5c0] ss:$16 sps:$4 sm:$0xff]   ;;  %v2129_v40 = vld [vmem:[#allocation6 + $0x5c8] ss:$16 sps:$4 sm:$0xff]  }
 0x157   :  { %v1840_v44 = vpack.c.bf16 %v560_v41, %v560_v41  ;;  %v2134_v41 = vld [vmem:[#allocation6 + $0x5e4] ss:$16 sps:$4 sm:$0xff]  }
 0x159   :  { %1015 = vmatmul.mubr.bf16.vlgmr.msra.gmra.mrb[4].mxu0 %v1840_v44  ;;  %1056 = vmatmul.mubr.bf16.vlgmr.msra.gmra.mrb[4].mxu1 %v1840_v44  ;;  %v2135_v44 = vld [vmem:[#allocation6 + $0x5e8] ss:$16 sps:$4 sm:$0xff]  }
 0x15a   :  { %1498 = vmatpush1.bf16.msra.mxu0 %v2042_v42  ;;  %1539 = vmatpush1.bf16.msra.mxu1 %v2045_v43  ;;  %v2137_v42 = vld [vmem:[#allocation6 + $0x5ec] ss:$16 sps:$4 sm:$0xff]   ;;  %v2132_v43 = vld [vmem:[#allocation6 + $0x5e0] ss:$16 sps:$4 sm:$0xff]  }
 0x15b   :  { %1499 = vmatprep.subr.bf16.mxu0 %v2050_v45  ;;  %1540 = vmatprep.subr.bf16.mxu1 %v2053_v46  ;;  %v1078_v45 = vld [vmem:[#allocation3 + $0x10] sm:$0xff] }
 0x15c   :  { %v1843_v46 = vpack.c.bf16 %v1078_v45, %v1078_v45 }
 0x15e   :  { %1500 = vmatpush1.bf16.msra.mxu0 %v2048_v47  ;;  %1541 = vmatpush1.bf16.msra.mxu1 %v2051_v48  ;;  %v1689_v47 = vld [vmem:[%s2380_s3 + $0x4] sm:$0xf] }
 0x15f   :  { %1501 = vmatprep.subr.bf16.mxu0 %v2056_v49  ;;  %1542 = vmatprep.subr.bf16.mxu1 %v2059_v50  ;;  %v646_v48 = vrot.slane %v1689_v47, %v2324_v10 }
 0x160   :  { %1529 = vmatprep.mubr.bf16.mxu0 %v1843_v46  ;;  %1570 = vmatprep.mubr.bf16.mxu1 %v1843_v46 }
 0x162   :  { %1502 = vmatpush1.bf16.msra.mxu0 %v2054_v51  ;;  %1543 = vmatpush1.bf16.msra.mxu1 %v2057_v52  ;;  %v642_v52 = vrot.slane %v1689_v47, %v2329_v12 }
 0x163   :  { %1503 = vmatprep.subr.bf16.mxu0 %v2062_v53  ;;  %1544 = vmatprep.subr.bf16.mxu1 %v2065_v54 }
 0x166   :  { %1504 = vmatpush1.bf16.msra.mxu0 %v2060_v55  ;;  %1545 = vmatpush1.bf16.msra.mxu1 %v2063_v56 }
 0x167   :  { %1505 = vmatprep.subr.bf16.mxu0 %v2068_v57  ;;  %1546 = vmatprep.subr.bf16.mxu1 %v2071_v58  ;;  %v638_v57 = vrot.slane %v1689_v47, %v2332_v14 }
 0x16a   :  { %1506 = vmatpush1.bf16.msra.mxu0 %v2066_v59  ;;  %1547 = vmatpush1.bf16.msra.mxu1 %v2069_v60 }
 0x16b   :  { %1507 = vmatprep.subr.bf16.mxu0 %v2074_v61  ;;  %1548 = vmatprep.subr.bf16.mxu1 %v2077_v62 }
 0x16e   :  { %1508 = vmatpush1.bf16.msra.mxu0 %v2072_v63  ;;  %1549 = vmatpush1.bf16.msra.mxu1 %v2075_v0 }
 0x16f   :  { %1509 = vmatprep.subr.bf16.mxu0 %v2080_v1  ;;  %1550 = vmatprep.subr.bf16.mxu1 %v2083_v2 }
 0x172   :  { %1510 = vmatpush1.bf16.msra.mxu0 %v2078_v3  ;;  %1551 = vmatpush1.bf16.msra.mxu1 %v2081_v4  ;;  %v650_v4 = vrot.slane %v1689_v47, %v2336_v31 }
 0x173   :  { %1511 = vmatprep.subr.bf16.mxu0 %v2086_v5  ;;  %1552 = vmatprep.subr.bf16.mxu1 %v2089_v6 }
 0x176   :  { %1512 = vmatpush1.bf16.msra.mxu0 %v2084_v7  ;;  %1553 = vmatpush1.bf16.msra.mxu1 %v2087_v8 }
 0x177   :  { %1513 = vmatprep.subr.bf16.mxu0 %v2092_v9  ;;  %1554 = vmatprep.subr.bf16.mxu1 %v2095_v11 }
 0x17a   :  { %1514 = vmatpush1.bf16.msra.mxu0 %v2090_v13  ;;  %1555 = vmatpush1.bf16.msra.mxu1 %v2093_v15  ;;  %v1756_v15 = vld [vmem:[%s2380_s3 + $0x8] sm:$0xf]  ;;  %s2258_s3 = smov [#allocation9]  }
 0x17b   :  { %1515 = vmatprep.subr.bf16.mxu0 %v2098_v16  ;;  %1556 = vmatprep.subr.bf16.mxu1 %v2101_v17  ;;  %v1161_v16 = vrot.slane %v1756_v15, %v2324_v10  ;;  %s1609_s24 = sshll.u32 %s2258_s3, 4  ;;  %s1610_s24 = int_to_ptr.vmem [resolvable:$true] %s1609_s24 }
 0x17c   :  { %s2202_s25 = scalar_lea.vmem %s1610_s24, 384  ;;  %p2207_p3 = scmp.lt.s32.totalorder %s1610_s24, %s1610_s24 }
 0x17d   :  { %p2203_p2 = scmp.ne.s32.totalorder %s1610_s24, %s2202_s25  ;;  %p2208_p4 = scmp.lt.s32.totalorder %s2202_s25, %s2202_s25 }
 0x17e   :  { %1516 = vmatpush1.bf16.msra.mxu0 %v2096_v18  ;;  %1557 = vmatpush1.bf16.msra.mxu1 %v2099_v19 }
 0x17f   :  { %1517 = vmatprep.subr.bf16.mxu0 %v2104_v20  ;;  %1558 = vmatprep.subr.bf16.mxu1 %v2107_v21  ;;  %v1157_v20 = vrot.slane %v1756_v15, %v2329_v12  ;;  %v1165_v12 = vrot.slane %v1756_v15, %v2336_v31  ;;  %p2209_p5 = por %p2208_p4, %p2207_p3 }
 0x181   :  { %p2210_p6 = pnand %p2209_p5, %p2203_p2 }
 0x182   :  { %1518 = vmatpush1.bf16.msra.mxu0 %v2102_v22  ;;  %1559 = vmatpush1.bf16.msra.mxu1 %v2105_v23 }
 0x183   :  { %1519 = vmatprep.subr.bf16.mxu0 %v2110_v24  ;;  %1560 = vmatprep.subr.bf16.mxu1 %v2113_v25  ;;  %v1153_v25 = vrot.slane %v1756_v15, %v2332_v14 }
 0x186   :  { %1520 = vmatpush1.bf16.msra.mxu0 %v2108_v26  ;;  %1561 = vmatpush1.bf16.msra.mxu1 %v2111_v27 }
 0x187   :  { %1521 = vmatprep.subr.bf16.mxu0 %v2116_v28  ;;  %1562 = vmatprep.subr.bf16.mxu1 %v2119_v29 }
 0x18a   :  { %1522 = vmatpush1.bf16.msra.mxu0 %v2114_v30  ;;  %1563 = vmatpush1.bf16.msra.mxu1 %v2117_v32 }
 0x18b   :  { %1523 = vmatprep.subr.bf16.mxu0 %v2122_v33  ;;  %1564 = vmatprep.subr.bf16.mxu1 %v2125_v34 }
 0x18e   :  { %1524 = vmatpush1.bf16.msra.mxu0 %v2120_v35  ;;  %1565 = vmatpush1.bf16.msra.mxu1 %v2123_v36 }
 0x18f   :  { %1525 = vmatprep.subr.bf16.mxu0 %v2128_v37  ;;  %1566 = vmatprep.subr.bf16.mxu1 %v2131_v38 }
 0x192   :  { %1526 = vmatpush1.bf16.msra.mxu0 %v2126_v39  ;;  %1567 = vmatpush1.bf16.msra.mxu1 %v2129_v40 }
 0x193   :  { %1527 = vmatprep.subr.bf16.mxu0 %v2134_v41  ;;  %1568 = vmatprep.subr.bf16.mxu1 %v2137_v42 }
 0x196   :  { %1528 = vmatpush1.bf16.msra.mxu0 %v2132_v43  ;;  %1569 = vmatpush1.bf16.msra.mxu1 %v2135_v44 }
 0x22c   :  { %v1016_v49 = vpop.f32.mrb[4].mxu0  ;;  %v1057_v50 = vpop.f32.mrb[4].mxu1 }
 0x22d   :  { %v1058_v51 = vadd.f32 %v1057_v50, %v646_v48  ;;  %v1018_v53 = vpop.f32.mrb[5].mxu0  ;;  %v1059_v54 = vpop.f32.mrb[5].mxu1  ;;  %v1017_v62 = vadd.f32 %v1016_v49, %v638_v57 }
 0x22e   :  { %v1020_v55 = vpop.f32.mrb[6].mxu0  ;;  %v1061_v56 = vpop.f32.mrb[6].mxu1  ;;  %v1019_v61 = vadd.f32 %v1018_v53, %v642_v52  ;;  %v1060_v8 = vadd.f32 %v1059_v54, %v650_v4 }
 0x22f   :  { %v1064_v58 = vmul.f32 0.5, %v1058_v51  ;;  %v1021_v59 = vpop.f32.mrb[7].mxu0  ;;  %v1062_v60 = vpop.f32.mrb[7].mxu1 }
 0x231   :  { %2144 = vtanh.f32 %v1064_v58 }
 0x232   :  { %2146 = vtanh.f32 %v1019_v61 }
 0x233   :  { %2148 = vtanh.f32 %v1017_v62 }
 0x23b   :  { %v2145_v63 = vpop.eup %2144 }
 0x23c   :  { %v1066_v0 = vadd.f32 1.0, %v2145_v63  ;;  %v2147_v2 = vpop.eup %2146 }
 0x23d   :  { %v2149_v6 = vpop.eup %2148 }
 0x23e   :  { %v1067_v1 = vmul.f32 0.5, %v1066_v0 }
 0x240   :  { %v1069_v3 = vsub.f32 1.0, %v1067_v1  ;;  %v1072_v5 = vmul.f32 %v2147_v2, %v1067_v1 }
 0x242   :  { %v1070_v7 = vmul.f32 %v2149_v6, %v1069_v3 }
 0x244   :  { %v1073_v9 = vadd.f32 %v1072_v5, %v1070_v7 }
 0x246   :  { %v1075_v11 = vadd.f32 %v1073_v9, %v1060_v8  ;;  %1074 = vst [vmem:[#allocation9 + $0x8] sm:$0xff] %v1073_v9 }
 0x248   :  { %v1842_v13 = vpack.c.bf16 %v1075_v11, %v1075_v11 }
 0x24a   :  { %1530 = vmatmul.mubr.bf16.vlgmr.msra.gmra.mrb[8].mxu0 %v1842_v13  ;;  %1571 = vmatmul.mubr.bf16.vlgmr.msra.gmra.mrb[8].mxu1 %v1842_v13 }
 0x31d   :  { %v1531_v17 = vpop.f32.mrb[8].mxu0  ;;  %v1572_v18 = vpop.f32.mrb[8].mxu1 }
 0x31e   :  { %v1573_v19 = vadd.f32 %v1572_v18, %v1161_v16  ;;  %v1533_v21 = vpop.f32.mrb[9].mxu0  ;;  %v1574_v22 = vpop.f32.mrb[9].mxu1  ;;  %v1532_v30 = vadd.f32 %v1531_v17, %v1153_v25 }
 0x31f   :  { %v1535_v23 = vpop.f32.mrb[10].mxu0  ;;  %v1576_v24 = vpop.f32.mrb[10].mxu1  ;;  %v1534_v29 = vadd.f32 %v1533_v21, %v1157_v20  ;;  %v1575_v38 = vadd.f32 %v1574_v22, %v1165_v12 }
 0x320   :  { %v1579_v26 = vmul.f32 0.5, %v1573_v19  ;;  %v1536_v27 = vpop.f32.mrb[11].mxu0  ;;  %v1577_v28 = vpop.f32.mrb[11].mxu1 }
 0x322   :  { %2150 = vtanh.f32 %v1579_v26 }
 0x323   :  { %2152 = vtanh.f32 %v1534_v29 }
 0x324   :  { %2154 = vtanh.f32 %v1532_v30 }
 0x32c   :  { %v2151_v10 = vpop.eup %2150 }
 0x32d   :  { %v1581_v32 = vadd.f32 1.0, %v2151_v10  ;;  %v2153_v34 = vpop.eup %2152 }
 0x32e   :  { %v2155_v37 = vpop.eup %2154 }
 0x32f   :  { %v1582_v33 = vmul.f32 0.5, %v1581_v32 }
 0x331   :  { %v1584_v35 = vsub.f32 1.0, %v1582_v33  ;;  %v1587_v36 = vmul.f32 %v2153_v34, %v1582_v33 }
 0x333   :  { %v1585_v14 = vmul.f32 %v2155_v37, %v1584_v35 }
 0x335   :  { %v1588_v39 = vadd.f32 %v1587_v36, %v1585_v14 }
 0x337   :  { %v1590_v40 = vadd.f32 %v1588_v39, %v1575_v38  ;;  %1589 = vst [vmem:[#allocation9 + $0x10] sm:$0xff] %v1588_v39 }
 0x338   :  { %2213 = shalt.err (!%p2210_p6)
}
 0x339   :  { %s2214_s28 = scalar_lea.hbm %s2382_s5, 384 }
 0x33a   :  { %p2215_p7 = scmp.ne.s32.totalorder %s2382_s5, %s2214_s28  ;;  %p2218_p8 = scmp.lt.u32.totalorder %s2214_s28, %s2382_s5 }
 0x33c   :  { %p2220_p9 = pnand %p2218_p8, %p2215_p7 }
 0x33e   :  { %2223 = shalt.err (!%p2220_p9)
}
 0x33f   :  { %1612 = dma.vmem_to_hbm [thread:$0]  %s1610_s24, 384, %s2382_s5, [#allocation10]   ;;  %2156 = vtanh.f32 %v1590_v40 }
 0x340   :  { %s2259_s10 = smov [#allocation8]  }
 0x341   :  { %s1599_s11 = sshll.u32 %s2259_s10, 4  ;;  %s1600_s11 = int_to_ptr.vmem [resolvable:$true] %s1599_s11 }
 0x342   :  { %s2224_s12 = scalar_lea.vmem %s1600_s11, 128  ;;  %p2229_p11 = scmp.lt.s32.totalorder %s1600_s11, %s1600_s11 }
 0x343   :  { %p2225_p10 = scmp.ne.s32.totalorder %s1600_s11, %s2224_s12  ;;  %p2230_p12 = scmp.lt.s32.totalorder %s2224_s12, %s2224_s12 }
 0x345   :  { %p2231_p13 = por %p2230_p12, %p2229_p11 }
 0x347   :  { %p2232_p0 = pnand %p2231_p13, %p2225_p10 }
 0x349   :  { %v2157_v31 = vpop.eup %2156 }
 0x34a   :  { %1592 = vst [vmem:[#allocation8] sm:$0xff] %v2157_v31 }
 0x34b   :  { %2235 = shalt.err (!%p2232_p0)
}
 0x34c   :  { %s2236_s1 = scalar_lea.hbm %s2381_s4, 128 }
 0x34d   :  { %p2237_p1 = scmp.ne.s32.totalorder %s2381_s4, %s2236_s1  ;;  %p2240_p2 = scmp.lt.u32.totalorder %s2236_s1, %s2381_s4 }
 0x34f   :  { %p2242_p3 = pnand %p2240_p2, %p2237_p1 }
 0x351   :  { %2245 = shalt.err (!%p2242_p3)
}
 0x352   :  { %1602 = dma.vmem_to_hbm [thread:$0]  %s1600_s11, 128, %s2381_s4, [#allocation5]  }
 0x353   :  { %2250 = dma.done.wait [#allocation5], 128  }
 0x354   :  { %2251 = vsyncadd [#allocation5], 4294967168 }
 0x355   :  { %2252 = dma.done.wait [#allocation10], 384  }
 0x356   :  { %2253 = vsyncadd [#allocation10], 4294966912 }
 0x357   :  { %1619 = vsyncpa [#allocation4], 1 }
 0x358   :  { %1620 = vsyncpa [#allocation7], 1 }
 0x359   :  { %1621 = vsyncpa [#allocation5], 1 }
 0x35a   :  { %1622 = vsyncpa [#allocation10], 1 }

</bundles_post_ra>
